<compile_context>
chip_gen: v7x
topology: tpu7x:2x2x1
jax: 0.10.0
libtpu: 0.0.40
codegen_flags: <defaults>
</compile_context>

<pallas_src>
import jax
import jax.numpy as jnp
from jax.experimental import pallas as pl
from jax.experimental.pallas import tpu as pltpu

H1, H2 = 128, 64                        # hidden sizes from the PyTorch module

_VMEM_TILE_BUDGET = 24 * 1024 * 1024    # tile-sizing budget (safe on v7x 64 MiB)
_VMEM_LIMIT_BYTES = 48 * 1024 * 1024    # raise scoped VMEM limit (v5e default 16 MiB)
_TB_CAP = 8192                          # max batch rows per grid step


def _mlp_kernel(x_ref, w1_ref, b1_ref, w2_ref, b2_ref, w3_ref, b3_ref, o_ref):
    # Dropout layers act as identity (inference / model.eval()).
    # TODO(synk): training-mode dropout (pltpu.prng_seed/prng_random_bits masking).
    x = x_ref[...].astype(jnp.bfloat16)               # in-kernel cast: 1 f32 HBM read
    # fc1 + relu
    h1 = jnp.dot(x, w1_ref[...], preferred_element_type=jnp.float32)
    h1 = jnp.maximum(h1 + b1_ref[...], 0.0)
    # fc2 + relu
    h2 = jnp.dot(h1.astype(jnp.bfloat16), w2_ref[...],
                 preferred_element_type=jnp.float32)
    h2 = jnp.maximum(h2 + b2_ref[...], 0.0)
    # fc3 (out_features == 1): contract (1,H2)x(tb,H2) over H2 -> lane-dense (1, tb).
    # bf16 MXU with f32 accumulation; no materialized f32 h2.T transpose.
    logits = jax.lax.dot_general(
        w3_ref[...], h2.astype(jnp.bfloat16),
        dimension_numbers=(((1,), (1,)), ((), ())),
        preferred_element_type=jnp.float32)
    logits = logits + b3_ref[...]                      # (1, tb)
    o_ref[...] = jax.nn.sigmoid(logits).astype(o_ref.dtype)


def prepare_params(params):
    """One-time weight prep (bf16 casts / reshapes), kept OFF the per-call path."""
    w1, b1, w2, b2, w3, b3 = params
    return (
        w1.astype(jnp.bfloat16),                       # (D_in, 128)
        b1.reshape(1, H1).astype(jnp.float32),         # (1, 128)
        w2.astype(jnp.bfloat16),                       # (128, 64)
        b2.reshape(1, H2).astype(jnp.float32),         # (1, 64)
        w3.reshape(1, H2).astype(jnp.bfloat16),        # fc3 weight as a bf16 row
        b3.reshape(1, 1).astype(jnp.float32),          # (1, 1)
    )


def _choose_tb(B, D_in):
    """Batch-tile size: VMEM-budgeted, capped, megacore-friendly."""
    # Per-row VMEM: double-buffered f32 x tile + double-buffered f32 output row
    # + (2x safety) bf16/f32 intermediates (x_bf16, h1 f32+bf16, h2 f32+bf16, logits).
    per_row = (2 * D_in * 4 + 2 * 4
               + 2 * (2 * D_in + 6 * H1 + 6 * H2 + 4))
    tb_vmem = max(8, (_VMEM_TILE_BUDGET // per_row) // 8 * 8)
    tb_cap = min(tb_vmem, _TB_CAP)

    b_up = ((B + 7) // 8) * 8
    if b_up <= 256:
        # Latency regime: a single tile; per-step overhead dominates anyway.
        return min(b_up, tb_cap)
    # Moderate/large batches: at least 4 grid steps so v7x's 2 TCs each get >=2.
    tb_mc = (((b_up + 3) // 4) + 7) // 8 * 8
    return max(8, min(tb_cap, tb_mc))


def simple_dnn_forward(x, prepared):
    """x: [B, D_in] float32 -> [B, 1] float32 (inference-mode dropout)."""
    w1b, b1r, w2b, b2r, w3r, b3r = prepared
    B, D_in = x.shape

    tb = _choose_tb(B, D_in)
    g = pl.cdiv(B, tb)

    flops = 2 * B * (D_in * H1 + H1 * H2 + H2)
    bytes_accessed = (B * D_in * 4 + B * 4
                      + (D_in * H1 + H1 * H2 + H2) * 2 + (H1 + H2 + 1) * 4)

    out = pl.pallas_call(
        _mlp_kernel,
        out_shape=jax.ShapeDtypeStruct((g, 1, tb), jnp.float32),
        grid=(g,),
        in_specs=[
            pl.BlockSpec((tb, D_in), lambda i: (i, 0)),   # x tile (f32, pipelined)
            pl.BlockSpec((D_in, H1), lambda i: (0, 0)),   # w1 (VMEM resident)
            pl.BlockSpec((1, H1), lambda i: (0, 0)),      # b1
            pl.BlockSpec((H1, H2), lambda i: (0, 0)),     # w2
            pl.BlockSpec((1, H2), lambda i: (0, 0)),      # b2
            pl.BlockSpec((1, H2), lambda i: (0, 0)),      # w3 row (bf16)
            pl.BlockSpec((1, 1), lambda i: (0, 0)),       # b3
        ],
        # None on the leading dim squeezes it: kernel sees a (1, tb) out ref.
        out_specs=pl.BlockSpec((None, 1, tb), lambda i: (i, 0, 0)),
        compiler_params=pltpu.CompilerParams(
            dimension_semantics=("parallel",),            # megacore on v7x
            vmem_limit_bytes=_VMEM_LIMIT_BYTES,
        ),
        cost_estimate=pl.CostEstimate(
            flops=flops, transcendentals=B, bytes_accessed=bytes_accessed),
    )(x, w1b, b1r, w2b, b2r, w3r, b3r)

    # Lane-dense (g, 1, tb) slab -> (B, 1). Rows beyond B (clipped last tile)
    # are discarded here; pure layout plumbing in XLA.
    return out.reshape(g * tb, 1)[:B]


def init_params(key, input_size):
    """Deterministic init mimicking nn.Linear's U(-1/sqrt(fan_in), 1/sqrt(fan_in)).

    Weights stored as [fan_in, fan_out] (transposed vs. PyTorch) for x @ W.
    """
    dims = [(input_size, H1), (H1, H2), (H2, 1)]
    params = []
    for (fan_in, fan_out) in dims:
        key, kw, kb = jax.random.split(key, 3)
        bound = 1.0 / (fan_in ** 0.5)
        w = jax.random.uniform(kw, (fan_in, fan_out), jnp.float32, -bound, bound)
        b = jax.random.uniform(kb, (1, fan_out), jnp.float32, -bound, bound)
        params.extend([w, b])
    return tuple(params)


def _reference_f32(x, params):
    w1, b1, w2, b2, w3, b3 = params
    h1 = jnp.maximum(x @ w1 + b1, 0.0)
    h2 = jnp.maximum(h1 @ w2 + b2, 0.0)
    return jax.nn.sigmoid(h2 @ w3 + b3)


def _reference_bf16(x, params):
    """Reference matching the kernel's mixed-precision strategy (bf16 MXU, f32 acc)."""
    w1, b1, w2, b2, w3, b3 = params
    h1 = jnp.dot(x.astype(jnp.bfloat16), w1.astype(jnp.bfloat16),
                 preferred_element_type=jnp.float32)
    h1 = jnp.maximum(h1 + b1, 0.0)
    h2 = jnp.dot(h1.astype(jnp.bfloat16), w2.astype(jnp.bfloat16),
                 preferred_element_type=jnp.float32)
    h2 = jnp.maximum(h2 + b2, 0.0)
    logits = jnp.dot(h2.astype(jnp.bfloat16), w3.astype(jnp.bfloat16),
                     preferred_element_type=jnp.float32) + b3
    return jax.nn.sigmoid(logits)


if __name__ == "__main__":
    key = jax.random.PRNGKey(0)
    B, input_size = 8, 32

    key, kx, kp = jax.random.split(key, 3)
    x = jax.random.normal(kx, (B, input_size), jnp.float32)
    params = init_params(kp, input_size)
    prepared = prepare_params(params)          # one-time weight prep, off hot path

    out = jax.block_until_ready(simple_dnn_forward(x, prepared))
    assert out.shape == (B, 1), out.shape

    ref16 = _reference_bf16(x, params)
    ref32 = _reference_f32(x, params)
    assert jnp.allclose(out, ref16, atol=5e-3, rtol=5e-3), "mismatch vs bf16 reference"
    assert jnp.allclose(out, ref32, atol=3e-2, rtol=3e-2), "mismatch vs f32 reference"

    print("KERNEL_OK")
</pallas_src>

<mosaic_0001>
module attributes {stable_mosaic.version = 11 : i64} {
  func.func @_mlp_kernel(%arg0: i32, %arg1: memref<8x32xf32, #tpu.memory_space<vmem>>, %arg2: memref<32x128xbf16, #tpu.memory_space<vmem>>, %arg3: memref<1x128xf32, #tpu.memory_space<vmem>>, %arg4: memref<128x64xbf16, #tpu.memory_space<vmem>>, %arg5: memref<1x64xf32, #tpu.memory_space<vmem>>, %arg6: memref<1x64xbf16, #tpu.memory_space<vmem>>, %arg7: memref<1x1xf32, #tpu.memory_space<vmem>>, %arg8: memref<1x1x8xf32, #tpu.memory_space<vmem>>) attributes {dimension_semantics = [#tpu.dimension_semantics<parallel>], iteration_bounds = array<i64: 1>, scalar_prefetch = 0 : i64, scratch_operands = 0 : i64, tpu.core_type = #tpu.core_type<tc>, window_params = [{transform_indices = @transform_0, window_bounds = array<i64: 8, 32>}, {pipeline_mode = #tpu.pipeline_mode<synchronous>, transform_indices = @transform_1, window_bounds = array<i64: 32, 128>}, {pipeline_mode = #tpu.pipeline_mode<synchronous>, transform_indices = @transform_2, window_bounds = array<i64: 1, 128>}, {pipeline_mode = #tpu.pipeline_mode<synchronous>, transform_indices = @transform_3, window_bounds = array<i64: 128, 64>}, {pipeline_mode = #tpu.pipeline_mode<synchronous>, transform_indices = @transform_4, window_bounds = array<i64: 1, 64>}, {pipeline_mode = #tpu.pipeline_mode<synchronous>, transform_indices = @transform_5, window_bounds = array<i64: 1, 64>}, {pipeline_mode = #tpu.pipeline_mode<synchronous>, transform_indices = @transform_6, window_bounds = array<i64: 1, 1>}, {transform_indices = @transform_7, window_bounds = array<i64: 1, 1, 8>}]} {
    %c0 = arith.constant 0 : index
    %c0_0 = arith.constant 0 : index
    %0 = vector.load %arg1[%c0, %c0_0] : memref<8x32xf32, #tpu.memory_space<vmem>>, vector<8x32xf32>
    %1 = arith.truncf %0 : vector<8x32xf32> to vector<8x32xbf16>
    %c0_1 = arith.constant 0 : index
    %c0_2 = arith.constant 0 : index
    %2 = vector.load %arg2[%c0_1, %c0_2] : memref<32x128xbf16, #tpu.memory_space<vmem>>, vector<32x128xbf16>
    %cst = arith.constant dense<0.000000e+00> : vector<8x128xf32>
    %3 = tpu.matmul %1, %2, %cst {dimension_numbers = #tpu.dot_dimension_numbers<[1], [0], [0], [1], [0, 0, 1, 1], [], []>} : vector<8x32xbf16>, vector<32x128xbf16>, vector<8x128xf32> -> vector<8x128xf32>
    %c0_3 = arith.constant 0 : index
    %c0_4 = arith.constant 0 : index
    %4 = vector.load %arg3[%c0_3, %c0_4] : memref<1x128xf32, #tpu.memory_space<vmem>>, vector<1x128xf32>
    %5 = vector.broadcast %4 : vector<1x128xf32> to vector<8x128xf32>
    %6 = arith.addf %3, %5 : vector<8x128xf32>
    %cst_5 = arith.constant 0.000000e+00 : f32
    %7 = vector.broadcast %cst_5 : f32 to vector<8x128xf32>
    %8 = arith.maximumf %6, %7 : vector<8x128xf32>
    %9 = arith.truncf %8 : vector<8x128xf32> to vector<8x128xbf16>
    %c0_6 = arith.constant 0 : index
    %c0_7 = arith.constant 0 : index
    %10 = vector.load %arg4[%c0_6, %c0_7] : memref<128x64xbf16, #tpu.memory_space<vmem>>, vector<128x64xbf16>
    %cst_8 = arith.constant dense<0.000000e+00> : vector<8x64xf32>
    %11 = tpu.matmul %9, %10, %cst_8 {dimension_numbers = #tpu.dot_dimension_numbers<[1], [0], [0], [1], [0, 0, 1, 1], [], []>} : vector<8x128xbf16>, vector<128x64xbf16>, vector<8x64xf32> -> vector<8x64xf32>
    %c0_9 = arith.constant 0 : index
    %c0_10 = arith.constant 0 : index
    %12 = vector.load %arg5[%c0_9, %c0_10] : memref<1x64xf32, #tpu.memory_space<vmem>>, vector<1x64xf32>
    %13 = vector.broadcast %12 : vector<1x64xf32> to vector<8x64xf32>
    %14 = arith.addf %11, %13 : vector<8x64xf32>
    %cst_11 = arith.constant 0.000000e+00 : f32
    %15 = vector.broadcast %cst_11 : f32 to vector<8x64xf32>
    %16 = arith.maximumf %14, %15 : vector<8x64xf32>
    %c0_12 = arith.constant 0 : index
    %c0_13 = arith.constant 0 : index
    %17 = vector.load %arg6[%c0_12, %c0_13] : memref<1x64xbf16, #tpu.memory_space<vmem>>, vector<1x64xbf16>
    %18 = arith.truncf %16 : vector<8x64xf32> to vector<8x64xbf16>
    %cst_14 = arith.constant dense<0.000000e+00> : vector<1x8xf32>
    %19 = tpu.matmul %17, %18, %cst_14 {dimension_numbers = #tpu.dot_dimension_numbers<[1], [1], [0], [0], [0, 0, 1, 0], [], []>} : vector<1x64xbf16>, vector<8x64xbf16>, vector<1x8xf32> -> vector<1x8xf32>
    %c0_15 = arith.constant 0 : index
    %c0_16 = arith.constant 0 : index
    %20 = vector.load %arg7[%c0_15, %c0_16] : memref<1x1xf32, #tpu.memory_space<vmem>>, vector<1x1xf32>
    %21 = vector.broadcast %20 : vector<1x1xf32> to vector<1x8xf32>
    %22 = arith.addf %19, %21 : vector<1x8xf32>
    %23 = arith.negf %22 : vector<1x8xf32>
    %24 = math.exp %23 : vector<1x8xf32>
    %cst_17 = arith.constant 1.000000e+00 : f32
    %25 = vector.broadcast %cst_17 : f32 to vector<1x8xf32>
    %26 = arith.addf %25, %24 : vector<1x8xf32>
    %27 = arith.divf %25, %26 : vector<1x8xf32>
    %c0_18 = arith.constant 0 : index
    %c0_19 = arith.constant 0 : index
    %c0_20 = arith.constant 0 : index
    %28 = vector.load %arg8[%c0_18, %c0_19, %c0_20] : memref<1x1x8xf32, #tpu.memory_space<vmem>>, vector<1x1x8xf32>
    %29 = vector.shape_cast %28 : vector<1x1x8xf32> to vector<1x8xf32>
    %30 = vector.shape_cast %27 : vector<1x8xf32> to vector<1x1x8xf32>
    tpu.vector_store %arg8[%c0_18, %c0_19, %c0_20], %30 {strides = array<i32>} : memref<1x1x8xf32, #tpu.memory_space<vmem>>, vector<1x1x8xf32>,
    return
  }
  func.func @transform_0(%arg0: i32) -> (i32, i32) {
    %c0_i32 = arith.constant 0 : i32
    %c0_i32_0 = arith.constant 0 : i32
    return %arg0, %c0_i32 : i32, i32
  }
  func.func @transform_1(%arg0: i32) -> (i32, i32) {
    %c0_i32 = arith.constant 0 : i32
    %c0_i32_0 = arith.constant 0 : i32
    %c0_i32_1 = arith.constant 0 : i32
    return %c0_i32, %c0_i32_0 : i32, i32
  }
  func.func @transform_2(%arg0: i32) -> (i32, i32) {
    %c0_i32 = arith.constant 0 : i32
    %c0_i32_0 = arith.constant 0 : i32
    %c0_i32_1 = arith.constant 0 : i32
    return %c0_i32, %c0_i32_0 : i32, i32
  }
  func.func @transform_3(%arg0: i32) -> (i32, i32) {
    %c0_i32 = arith.constant 0 : i32
    %c0_i32_0 = arith.constant 0 : i32
    %c0_i32_1 = arith.constant 0 : i32
    return %c0_i32, %c0_i32_0 : i32, i32
  }
  func.func @transform_4(%arg0: i32) -> (i32, i32) {
    %c0_i32 = arith.constant 0 : i32
    %c0_i32_0 = arith.constant 0 : i32
    %c0_i32_1 = arith.constant 0 : i32
    return %c0_i32, %c0_i32_0 : i32, i32
  }
  func.func @transform_5(%arg0: i32) -> (i32, i32) {
    %c0_i32 = arith.constant 0 : i32
    %c0_i32_0 = arith.constant 0 : i32
    %c0_i32_1 = arith.constant 0 : i32
    return %c0_i32, %c0_i32_0 : i32, i32
  }
  func.func @transform_6(%arg0: i32) -> (i32, i32) {
    %c0_i32 = arith.constant 0 : i32
    %c0_i32_0 = arith.constant 0 : i32
    %c0_i32_1 = arith.constant 0 : i32
    return %c0_i32, %c0_i32_0 : i32, i32
  }
  func.func @transform_7(%arg0: i32) -> (i32, i32, i32) {
    %c0_i32 = arith.constant 0 : i32
    %c0_i32_0 = arith.constant 0 : i32
    %c0_i32_1 = arith.constant 0 : i32
    return %arg0, %c0_i32, %c0_i32_0 : i32, i32, i32
  }
}

</mosaic_0001>

<bundles_post_ra>
// kernel: tpu_custom_call.1
= control target key start
LH: loop header
LB: loop body
LE: loop exit
PB: predicated region body
PF: predicated region fallthrough
CT: control target
= control target key end

     0   :  { %s504_s0 = inlined_call_operand.vmem [shape: f32[8,32], index: 0, kind: input, shape index: {}]   ;;  %s505_s1 = inlined_call_operand.vmem [shape: bf16[32,128], index: 1, kind: input, shape index: {}]   ;;  %s506_s2 = inlined_call_operand.vmem [shape: f32[1,128], index: 2, kind: input, shape index: {}]   ;;  %s507_s3 = inlined_call_operand.vmem [shape: bf16[128,64], index: 3, kind: input, shape index: {}]   ;;  %s508_s4 = inlined_call_operand.vmem [shape: f32[1,64], index: 4, kind: input, shape index: {}]   ;;  %s509_s5 = inlined_call_operand.vmem [shape: bf16[1,64], index: 5, kind: input, shape index: {}]   ;;  %s510_s6 = inlined_call_operand.<no memory space> [shape: f32[1,1], index: 6, kind: input, shape index: {}]   ;;  %s511_s7 = inlined_call_operand.hbm [shape: f32[1,1,8], index: 7, kind: output, shape index: {}]  }
   0x1   :  { %v12_v0 = vstv %s510_s6 }
   0x2   :  { %13 = vst [vmem:[#allocation2] sm:$0x1] %v12_v0 }
   0x3   :  { %v362_v1 = vld [vmem:[%s505_s1] sm:$0xff]   ;;  %v400_v2 = vmov 0.0   ;;  %v363_v3 = vld [vmem:[%s505_s1 + $0x8] sm:$0xff]   ;;  %vm401_vm0 = vmmov 0   ;;  %vm55_vm1 = vcmask 261120   ;;  %v366_v8 = vld [vmem:[%s507_s3 + $0x10] sm:$0xff]  }
   0x4   :  { %323 = vmatprep.subr.bf16.mxu0 %v400_v2  ;;  %331 = vmatprep.subr.bf16.mxu1 %v400_v2  ;;  %v30_v4 = vld [vmem:[%s504_s0] sm:$0xff]  ;;  %v365_v7 = vld [vmem:[%s507_s3 + $0x8] sm:$0xff]  }
   0x5   :  { %324 = vmatpush3.bf16.msra.mxu0 %v362_v1  ;;  %327 = vmatprep.mubr.msk.bf16.mxu0 %vm401_vm0, %v400_v2  ;;  %v364_v5 = vld [vmem:[%s507_s3] sm:$0xff]   ;;  %v31_v6 = vpack.c.bf16 %v30_v4, %v30_v4 }
   0x6   :  { %325 = vmatprep.subr.bf16.mxu0 %v400_v2  ;;  %347 = vmatprep.mubr.msk.bf16.mxu1 %vm401_vm0, %v400_v2 }
   0x7   :  { %332 = vmatpush3.bf16.msra.mxu1 %v364_v5 }
   0x8   :  { %333 = vmatprep.subr.bf16.mxu1 %v400_v2 }
   0x9   :  { %326 = vmatpush3.bf16.msra.mxu0 %v363_v3 }
   0xa   :  { %351 = vmatprep.subr.bf16.mxu0 %v400_v2 }
   0xb   :  { %334 = vmatpush3.bf16.msra.mxu1 %v365_v7 }
   0xc   :  { %328 = vmatmul.mubr.msk.bf16.vlgmr.msra.gmra.mrb[0].mxu0 %vm55_vm1, %v31_v6  ;;  %335 = vmatprep.subr.bf16.mxu1 %v400_v2 }
   0xd   :  { %353 = vmatprep.mubr.msk.bf16.mxu0 %vm401_vm0, %v400_v2 }
   0xe   :  { %14 = vsyncpa [#allocation4], 0  ;;  %v367_v9 = vld [vmem:[%s507_s3 + $0x18] sm:$0xff]   ;;  %v368_v10 = vld [vmem:[%s507_s3 + $0x20] sm:$0xff]   ;;  %v402_v23 = vmov 0   ;;  %vm225_vm2 = vcmask 523264   ;;  %v221_v34 = vlaneseq }
   0xf   :  { %336 = vmatpush3.bf16.msra.mxu1 %v366_v8  ;;  %v369_v11 = vld [vmem:[%s507_s3 + $0x28] sm:$0xff]   ;;  %v370_v12 = vld [vmem:[%s507_s3 + $0x30] sm:$0xff]   ;;  %v371_v13 = vld [vmem:[%s507_s3 + $0x38] sm:$0xff]   ;;  %361 = vset.pattern.permute.xlu0 %v402_v23  ;;  %vm278_vm3 = vcmask 57344  }
  0x10   :  { %337 = vmatprep.subr.bf16.mxu1 %v400_v2  ;;  %v294_v14 = vld [vmem:[%s506_s2] ss:$0 sm:$0xff]  ;;  %v222_v35 = vshrl.u32 %v221_v34, 7 }
  0x11   :  { %v215_v22 = vld [vmem:[#allocation2] sm:$0x1] }
  0x12   :  { %218 = vperm.xlu0 %361, %v215_v22   ;;  %v298_v24 = vld [vmem:[%s508_s4] ss:$0 sm:$0xff]  ;;  %v223_v36 = vsub.s32 0, %v222_v35  ;;  %s403_s4 = smov [#allocation3]  }
  0x13   :  { %338 = vmatpush3.bf16.msra.mxu1 %v367_v9  ;;  %v213_v33 = vld [vmem:[%s509_s5] sm:$0x1]  ;;  %s286_s26 = sshll.u32 %s403_s4, 4  ;;  %s287_s26 = int_to_ptr.vmem [resolvable:$true] %s286_s26 }
  0x14   :  { %339 = vmatprep.subr.bf16.mxu1 %v400_v2  ;;  %s376_s5 = scalar_lea.vmem %s287_s26, 16  ;;  %s380_s27 = scalar_lea.vmem %s287_s26, 32 }
  0x15   :  { %p377_p0 = scmp.ne.s32.totalorder %s287_s26, %s376_s5  ;;  %p381_p1 = scmp.lt.s32.totalorder %s287_s26, %s287_s26 }
  0x16   :  { %p382_p2 = scmp.lt.s32.totalorder %s380_s27, %s376_s5 }
  0x17   :  { %340 = vmatpush3.bf16.msra.mxu1 %v368_v10 }
  0x18   :  { %341 = vmatprep.subr.bf16.mxu1 %v400_v2  ;;  %p383_p3 = por %p382_p2, %p381_p1 }
  0x1a   :  { %p384_p4 = pnand %p383_p3, %p377_p0 }
  0x1b   :  { %342 = vmatpush3.bf16.msra.mxu1 %v369_v11 }
  0x1c   :  { %343 = vmatprep.subr.bf16.mxu1 %v400_v2 }
  0x1f   :  { %344 = vmatpush3.bf16.msra.mxu1 %v370_v12 }
  0x20   :  { %345 = vmatprep.subr.bf16.mxu1 %v400_v2 }
  0x23   :  { %346 = vmatpush3.bf16.msra.mxu1 %v371_v13 }
  0x91   :  { %v219_v37 = vpop.permute.xlu0 %218 }
  0x92   :  { %v224_v38 = vrot.slane %v219_v37, %v223_v36 }
  0xdf   :  { %v93_v15 = vpop.f32.mrb[0].mxu0 }
  0xe0   :  { %v94_v16 = vadd.f32 %v294_v14, %v93_v15  ;;  %v329_v17 = vpop.f32.mrb[1].mxu0 }
  0xe1   :  { %v96_v18 = vpop.f32.mrb[2].mxu0 }
  0xe2   :  { %v99_v19 = vmax.f32 %v94_v16, 0.0  ;;  %v330_v20 = vpop.f32.mrb[3].mxu0 }
  0xe4   :  { %v100_v21 = vpack.c.bf16 %v99_v19, %v99_v19 }
  0xe6   :  { %348 = vmatmul.mubr.bf16.vlgmr.msra.gmra.mrb[0].mxu1 %v100_v21 }
 0x1b9   :  { %v206_v25 = vpop.f32.mrb[0].mxu1 }
 0x1ba   :  { %v207_v26 = vadd.f32 %v298_v24, %v206_v25  ;;  %v349_v27 = vpop.f32.mrb[1].mxu1 }
 0x1bb   :  { %v209_v28 = vpop.f32.mrb[2].mxu1 }
 0x1bc   :  { %v212_v29 = vmax.f32 %v207_v26, 0.0  ;;  %v350_v30 = vpop.f32.mrb[3].mxu1 }
 0x1be   :  { %v214_v31 = vpack.c.bf16 %v212_v29, %v212_v29 }
 0x1c0   :  { %v230_v32 = vsel %vm225_vm2, %v214_v31, 0 }
 0x1c1   :  { %352 = vmatpush3.bf16.xpose.msra.mxu0 %v230_v32 }
 0x1c8   :  { %354 = vmatmul.mubr.msk.bf16.vlgmr.msra.gmra.mrb[4].mxu0 %vm225_vm2, %v213_v33 }
 0x29b   :  { %v266_v39 = vpop.f32.mrb[4].mxu0 }
 0x29c   :  { %v267_v40 = vadd.f32 %v266_v39, %v224_v38  ;;  %v355_v41 = vpop.f32.mrb[5].mxu0 }
 0x29d   :  { %v269_v42 = vpop.f32.mrb[6].mxu0 }
 0x29e   :  { %v308_v43 = vmul.f32 -1.442695, %v267_v40  ;;  %v356_v44 = vpop.f32.mrb[7].mxu0 }
 0x2a0   :  { %372 = vpow2.f32 %v308_v43 }
 0x2aa   :  { %v373_v45 = vpop.eup %372 }
 0x2ab   :  { %v275_v46 = vadd.f32 1.0, %v373_v45 }
 0x2ad   :  { %374 = vrcp.f32 %v275_v46 }
 0x2b7   :  { %v375_v47 = vpop.eup %374 }
 0x2b8   :  { %279 = vst.msk [vmem:[#allocation3] sm:$0x1] %vm278_vm3, %v375_v47 }
 0x2b9   :  { %387 = shalt.err (!%p384_p4)
}
 0x2ba   :  { %s388_s30 = scalar_lea.hbm %s511_s7, 16 }
 0x2bb   :  { %p389_p5 = scmp.ne.s32.totalorder %s511_s7, %s388_s30  ;;  %p392_p6 = scmp.lt.u32.totalorder %s388_s30, %s511_s7 }
 0x2bd   :  { %p394_p7 = pnand %p392_p6, %p389_p5 }
 0x2bf   :  { %397 = shalt.err (!%p394_p7)
}
 0x2c0   :  { %289 = dma.vmem_to_hbm [thread:$0]  %s287_s26, 16, %s511_s7, [#allocation4]  }
 0x2c1   :  { %398 = dma.done.wait [#allocation4], 16  }
 0x2c2   :  { %399 = vsyncadd [#allocation4], 4294967280 }
 0x2c3   :  { %293 = vsyncpa [#allocation4], 1 }

</bundles_post_ra>
